<compile_context>
chip_gen: v6e
topology: v6e:2x2x1
jax: 0.10.0
libtpu: 0.0.40
codegen_flags: <defaults>
</compile_context>

<pallas_src>
import math

import jax
import jax.numpy as jnp
from jax.experimental import pallas as pl
from jax.experimental.pallas import tpu as pltpu

_LANE = 128
_MAX_LANE_WIDTH = 8192            # lane-width cap (multiple of 128)
_MIN_SPLIT_BYTES = 4 << 20        # only force >=2 grid steps above this


def _round_up(x, m):
    return -(-x // m) * m


def _round_down(x, m):
    return (x // m) * m


def _row_pack(dtype):
    """Rows per packed sublane group: 8 for 32-bit, 16 for 16-bit, 32 for 8-bit."""
    itemsize = jnp.dtype(dtype).itemsize
    if itemsize >= 4:
        return 8
    if itemsize == 2:
        return 16
    return 32


_VMEM_CFG = None


def _vmem_config():
    """(per-step in-flight budget bytes, vmem_limit_bytes), chip-generation aware."""
    global _VMEM_CFG
    if _VMEM_CFG is None:
        cap = None
        try:
            cap = getattr(pltpu.get_tpu_info(), "vmem_capacity_bytes", None)
        except Exception:          # query unavailable: fall back conservatively
            cap = None
        if cap:
            # v5e/v6e (128 MiB VMEM): 48 MiB budget / 64 MiB limit.
            # v7x (64 MiB per TC):    24 MiB budget / 32 MiB limit.
            budget = max(8 << 20, min(48 << 20, (cap * 3) // 8))
            limit = max(16 << 20, min(64 << 20, cap // 2))
        else:
            budget, limit = 12 << 20, 32 << 20   # safe on every generation
        _VMEM_CFG = (int(budget), int(limit))
    return _VMEM_CFG


# ----------------------------------------------------------------------------
# Layout helpers
# ----------------------------------------------------------------------------
def _pick_lane_layout(total, row_pack):
    """Factor `total` as (rows, lanes): lanes a multiple of 128, rows filling
    full (packed) sublanes whenever possible.  Returns None for odd sizes."""
    if total % _LANE != 0:
        return None
    divisors = [d for d in range(_LANE, min(total, _MAX_LANE_WIDTH) + 1, _LANE)
                if total % d == 0]
    # 1) widest lanes whose row count is a multiple of the packing factor,
    # 2) else widest lanes that still fill every sublane (rows >= pack),
    # 3) else (tiny tensor) widest lanes available.
    best = max((d for d in divisors if (total // d) % row_pack == 0), default=None)
    if best is None:
        best = max((d for d in divisors if (total // d) >= row_pack), default=None)
    if best is None:
        best = max(divisors)
    return total // best, best


def _pick_row_tile(rows, in_flight_bytes_per_row, row_pack, split_for_cores, budget):
    """Largest pack-aligned row tile within the VMEM budget; forces >= 2 grid
    steps (so v7x's two TensorCores both get work) when asked."""
    if rows <= row_pack:
        return rows                                # full extent (always legal)
    budget_rows = max(row_pack,
                      _round_down(budget // max(1, in_flight_bytes_per_row), row_pack))
    if _round_up(rows, row_pack) <= budget_rows:
        tile = rows                                # whole thing fits in one step
        if split_for_cores and rows >= 2 * row_pack:
            tile = min(rows, _round_up(pl.cdiv(rows, 2), row_pack))
        return tile
    return min(budget_rows, rows)


# ----------------------------------------------------------------------------
# sum / mean reduction
# ----------------------------------------------------------------------------
def _reduce_dtypes(in_dtype, do_mean):
    if jnp.issubdtype(in_dtype, jnp.floating):
        return jnp.dtype(jnp.float32), in_dtype
    if do_mean:
        # torch true-divides integer sums -> float output.
        return jnp.dtype(jnp.float32), jnp.dtype(jnp.float32)
    # Wide ints accumulate in their own dtype (wrap matches torch); narrow ints
    # widen to int32, final cast back reproduces torch's wrap-around.
    acc = in_dtype if in_dtype.itemsize >= 4 else jnp.dtype(jnp.int32)
    return acc, in_dtype


def _jax_sum_mean(selected, do_mean, acc_dtype, out_dtype):
    acc = selected[0].astype(acc_dtype)
    for x in selected[1:]:
        acc = acc + x.astype(acc_dtype)
    if do_mean:
        acc = acc / len(selected)
    return acc.astype(out_dtype)


def _make_sum_kernel(num_chosen, do_mean, acc_dtype):
    inv = 1.0 / float(num_chosen)

    def kernel(*refs):
        x_refs, o_ref = refs[:-1], refs[-1]
        acc = x_refs[0][...].astype(acc_dtype)
        for r in x_refs[1:]:
            acc = acc + r[...].astype(acc_dtype)
        if do_mean:
            acc = acc * jnp.asarray(inv, dtype=acc_dtype)
        o_ref[...] = acc.astype(o_ref.dtype)

    return kernel


def _pallas_sum_mean(selected, do_mean):
    K = len(selected)
    shape = selected[0].shape
    in_dtype = jnp.dtype(selected[0].dtype)
    total = math.prod(shape)
    acc_dtype, out_dtype = _reduce_dtypes(in_dtype, do_mean)

    row_pack = max(_row_pack(in_dtype), _row_pack(out_dtype))
    budget, vmem_limit = _vmem_config()

    layout = _pick_lane_layout(total, row_pack)
    if layout is None:
        # TODO(synk): non-128-divisible totals stay on fused XLA elementwise.
        return _jax_sum_mean(selected, do_mean, acc_dtype, out_dtype)
    rows, lanes = layout

    # In-flight bytes per row: K double-buffered input blocks + 1 output block.
    per_row = 2 * (K * in_dtype.itemsize + out_dtype.itemsize) * lanes
    if per_row * row_pack > budget:
        # Even a minimal (pack-high) tile set would not fit scoped VMEM.
        return _jax_sum_mean(selected, do_mean, acc_dtype, out_dtype)

    split = (K + 1) * total * in_dtype.itemsize >= _MIN_SPLIT_BYTES
    tile_rows = _pick_row_tile(rows, per_row, row_pack, split, budget)
    grid = (pl.cdiv(rows, tile_rows),)

    flat = [x.reshape(rows, lanes) for x in selected]
    block = (tile_rows, lanes)
    in_specs = [pl.BlockSpec(block, lambda t: (t, 0)) for _ in range(K)]
    out_spec = pl.BlockSpec(block, lambda t: (t, 0))

    cost = pl.CostEstimate(
        flops=(K - 1) * total, transcendentals=0,
        bytes_accessed=K * total * in_dtype.itemsize + total * out_dtype.itemsize)

    out = pl.pallas_call(
        _make_sum_kernel(K, do_mean, acc_dtype),
        out_shape=jax.ShapeDtypeStruct((rows, lanes), out_dtype),
        grid=grid,
        in_specs=in_specs,
        out_specs=out_spec,
        compiler_params=pltpu.CompilerParams(
            dimension_semantics=("parallel",),
            vmem_limit_bytes=vmem_limit),
        cost_estimate=cost,
    )(*flat)
    return out.reshape(shape)


# ----------------------------------------------------------------------------
# concat reduction (torch.cat(tensor_list, dim=1))
# ----------------------------------------------------------------------------
def _pallas_concat(selected):
    K = len(selected)
    shape = selected[0].shape
    N = shape[0]
    rest = shape[1:]
    M = math.prod(rest)
    in_dtype = jnp.dtype(selected[0].dtype)
    itemsize = in_dtype.itemsize
    out_shape_full = (N, K * rest[0]) + tuple(rest[1:])

    row_pack = _row_pack(in_dtype)
    budget, vmem_limit = _vmem_config()

    # In-flight per output row: K revisited input slabs (width M) + one output
    # slab (width M), each double buffered.
    per_row = 2 * (K + 1) * M * itemsize
    if (M % _LANE != 0) or (per_row * row_pack > budget):
        # TODO(synk): unaligned / oversized channel slabs stay on XLA concatenate
        # (pure DMA copy, same HBM bytes as the kernel would move).
        return jnp.concatenate(selected, axis=1)

    flat = [x.reshape(N, M) for x in selected]
    split = 2 * K * N * M * itemsize >= _MIN_SPLIT_BYTES
    tile_n = _pick_row_tile(N, per_row, row_pack, split, budget)
    grid = (pl.cdiv(N, tile_n), K)

    # Inputs keep block index (t, 0) across the k axis: their VMEM copies are
    # revisited (not re-DMA'd), while the output block (t, k) changes every
    # step so the store stays lane-dense (width M, a multiple of 128).
    in_specs = [pl.BlockSpec((tile_n, M), lambda t, k: (t, 0)) for _ in range(K)]
    out_spec = pl.BlockSpec((tile_n, M), lambda t, k: (t, k))

    def kernel(*refs):
        x_refs, o_ref = refs[:-1], refs[-1]
        k = pl.program_id(1)
        for kk in range(K):
            @pl.when(k == kk)
            def _(kk=kk):
                o_ref[...] = x_refs[kk][...]

    cost = pl.CostEstimate(flops=0, transcendentals=0,
                           bytes_accessed=2 * K * N * M * itemsize)

    out = pl.pallas_call(
        kernel,
        out_shape=jax.ShapeDtypeStruct((N, K * M), in_dtype),
        grid=grid,
        in_specs=in_specs,
        out_specs=out_spec,
        compiler_params=pltpu.CompilerParams(
            dimension_semantics=("parallel", "arbitrary"),
            vmem_limit_bytes=vmem_limit),
        cost_estimate=cost,
    )(*flat)
    return out.reshape(out_shape_full)


# ----------------------------------------------------------------------------
# ChosenInputs.forward
# ----------------------------------------------------------------------------
def chosen_inputs_forward(candidate_inputs, chosen, reduction):
    """Pallas implementation of ChosenInputs.forward.

    candidate_inputs: list of arrays (e.g. NCHW), identical shape/dtype.
    chosen: static int or list of ints indexing candidate_inputs.
    reduction: 'mean' | 'concat' | 'sum' | 'none'
    """
    if isinstance(chosen, int):
        chosen = [chosen]

    # Exact _tensor_reduction semantics for the trivial paths (no kernel).
    if reduction == 'none':
        return [candidate_inputs[i] for i in chosen]
    if not chosen:
        return None
    if len(chosen) == 1:
        return candidate_inputs[chosen[0]]

    selected = [candidate_inputs[i] for i in chosen]   # only the K chosen tensors

    if reduction in ('sum', 'mean'):
        return _pallas_sum_mean(selected, do_mean=(reduction == 'mean'))
    if reduction == 'concat':
        return _pallas_concat(selected)
    raise ValueError(f'Unrecognized reduction policy: "{reduction}"')


class ChosenInputs:
    """Thin module-like wrapper mirroring the PyTorch class."""

    def __init__(self, chosen, reduction):
        self.chosen = chosen if isinstance(chosen, list) else [chosen]
        self.reduction = reduction

    def __call__(self, candidate_inputs):
        return chosen_inputs_forward(candidate_inputs, self.chosen, self.reduction)


# ----------------------------------------------------------------------------
# Self-test
# ----------------------------------------------------------------------------
if __name__ == "__main__":
    key = jax.random.PRNGKey(0)
    keys = jax.random.split(key, 3)
    # 3 candidate inputs, each NCHW = (2, 4, 16, 16)
    candidates = [
        jax.random.normal(k, (2, 4, 16, 16), dtype=jnp.float32) for k in keys
    ]
    chosen = [0, 2]

    out_sum = chosen_inputs_forward(candidates, chosen, 'sum')
    out_mean = chosen_inputs_forward(candidates, chosen, 'mean')
    out_cat = chosen_inputs_forward(candidates, chosen, 'concat')
    out_none = chosen_inputs_forward(candidates, chosen, 'none')
    out_single = chosen_inputs_forward(candidates, 1, 'sum')

    # bf16 path (exercises the 16-row packing layout).
    cand_bf16 = [c.astype(jnp.bfloat16) for c in candidates]
    out_sum_bf16 = chosen_inputs_forward(cand_bf16, chosen, 'sum')

    # Non-128-divisible total: robust XLA fallback path.
    cand_odd = [jax.random.normal(k, (2, 3, 5, 7), dtype=jnp.float32) for k in keys]
    out_mean_odd = chosen_inputs_forward(cand_odd, [0, 1, 2], 'mean')

    jax.block_until_ready((out_sum, out_mean, out_cat, out_single,
                           out_sum_bf16, out_mean_odd))

    # Reference checks (plain JAX).
    ref_sum = candidates[0] + candidates[2]
    assert out_sum.shape == (2, 4, 16, 16)
    assert jnp.allclose(out_sum, ref_sum, atol=1e-6)
    assert jnp.allclose(out_mean, ref_sum / 2.0, atol=1e-6)
    ref_cat = jnp.concatenate([candidates[0], candidates[2]], axis=1)
    assert out_cat.shape == (2, 8, 16, 16)
    assert jnp.allclose(out_cat, ref_cat, atol=1e-6)
    assert isinstance(out_none, list) and len(out_none) == 2
    assert jnp.allclose(out_single, candidates[1], atol=1e-6)

    ref_sum_bf16 = (cand_bf16[0].astype(jnp.float32)
                    + cand_bf16[2].astype(jnp.float32)).astype(jnp.bfloat16)
    assert out_sum_bf16.dtype == jnp.bfloat16
    assert jnp.allclose(out_sum_bf16.astype(jnp.float32),
                        ref_sum_bf16.astype(jnp.float32), atol=2e-2)

    ref_odd = (cand_odd[0] + cand_odd[1] + cand_odd[2]) / 3.0
    assert jnp.allclose(out_mean_odd, ref_odd, atol=1e-5)

    print("KERNEL_OK")
</pallas_src>

<mosaic_0001>
module attributes {stable_mosaic.version = 11 : i64} {
  func.func @kernel(%arg0: i32, %arg1: memref<8x256xf32, #tpu.memory_space<vmem>>, %arg2: memref<8x256xf32, #tpu.memory_space<vmem>>, %arg3: memref<8x256xf32, #tpu.memory_space<vmem>>) attributes {dimension_semantics = [#tpu.dimension_semantics<parallel>], iteration_bounds = array<i64: 1>, scalar_prefetch = 0 : i64, scratch_operands = 0 : i64, tpu.core_type = #tpu.core_type<tc>, window_params = [{transform_indices = @transform_0, window_bounds = array<i64: 8, 256>}, {transform_indices = @transform_1, window_bounds = array<i64: 8, 256>}, {transform_indices = @transform_2, window_bounds = array<i64: 8, 256>}]} {
    %c0 = arith.constant 0 : index
    %c0_0 = arith.constant 0 : index
    %0 = vector.load %arg1[%c0, %c0_0] : memref<8x256xf32, #tpu.memory_space<vmem>>, vector<8x256xf32>
    %c0_1 = arith.constant 0 : index
    %c0_2 = arith.constant 0 : index
    %1 = vector.load %arg2[%c0_1, %c0_2] : memref<8x256xf32, #tpu.memory_space<vmem>>, vector<8x256xf32>
    %2 = arith.addf %0, %1 : vector<8x256xf32>
    %c0_3 = arith.constant 0 : index
    %c0_4 = arith.constant 0 : index
    %3 = vector.load %arg3[%c0_3, %c0_4] : memref<8x256xf32, #tpu.memory_space<vmem>>, vector<8x256xf32>
    tpu.vector_store %arg3[%c0_3, %c0_4], %2 {strides = array<i32>} : memref<8x256xf32, #tpu.memory_space<vmem>>, vector<8x256xf32>,
    return
  }
  func.func @transform_0(%arg0: i32) -> (i32, i32) {
    %c0_i32 = arith.constant 0 : i32
    %c0_i32_0 = arith.constant 0 : i32
    return %arg0, %c0_i32 : i32, i32
  }
  func.func @transform_1(%arg0: i32) -> (i32, i32) {
    %c0_i32 = arith.constant 0 : i32
    %c0_i32_0 = arith.constant 0 : i32
    return %arg0, %c0_i32 : i32, i32
  }
  func.func @transform_2(%arg0: i32) -> (i32, i32) {
    %c0_i32 = arith.constant 0 : i32
    %c0_i32_0 = arith.constant 0 : i32
    return %arg0, %c0_i32 : i32, i32
  }
}

</mosaic_0001>

<bundles_post_ra>
// kernel: tpu_custom_call.1
= control target key start
LH: loop header
LB: loop body
LE: loop exit
PB: predicated region body
PF: predicated region fallthrough
CT: control target
= control target key end

     0   :  { %7 = vsyncpa [#allocation3], 0  ;;  %s156_s0 = inlined_call_operand.hbm [shape: f32[8,256], index: 0, kind: input, shape index: {}]   ;;  %s157_s1 = inlined_call_operand.hbm [shape: f32[8,256], index: 1, kind: input, shape index: {}]   ;;  %s158_s2 = inlined_call_operand.hbm [shape: f32[8,256], index: 2, kind: output, shape index: {}]  }
   0x1   :  { %8 = vsyncpa [#allocation6], 0 }
   0x2   :  { %9 = vsyncpa [#allocation4], 0  ;;  %s129_s9 = smov [#allocation2]   ;;  %s130_s11 = smov [#allocation5]  }
   0x3   :  { %s16_s10 = sshll.u32 %s129_s9, 4  ;;  %s26_s12 = sshll.u32 %s130_s11, 4  ;;  %s17_s10 = int_to_ptr.vmem [resolvable:$true] %s16_s10  ;;  %s27_s12 = int_to_ptr.vmem [resolvable:$true] %s26_s12 }
   0x4   :  { %s71_s13 = scalar_lea.vmem %s17_s10, 256  ;;  %p76_p1 = scmp.lt.s32.totalorder %s17_s10, %s17_s10 }
   0x5   :  { %p72_p0 = scmp.ne.s32.totalorder %s17_s10, %s71_s13  ;;  %p77_p2 = scmp.lt.s32.totalorder %s71_s13, %s71_s13 }
   0x7   :  { %p78_p3 = por %p77_p2, %p76_p1 }
   0x9   :  { %p79_p4 = pnand %p78_p3, %p72_p0 }
   0xb   :  { %82 = shalt.err (!%p79_p4)
}
   0xc   :  { %19 = dma.hbm_to_vmem [thread:$0]  %s156_s0, 256, %s17_s10, [#allocation3]  }
   0xd   :  { %s91_s16 = scalar_lea.vmem %s27_s12, 256  ;;  %p96_p6 = scmp.lt.s32.totalorder %s27_s12, %s27_s12 }
   0xe   :  { %p92_p5 = scmp.ne.s32.totalorder %s27_s12, %s91_s16  ;;  %p97_p7 = scmp.lt.s32.totalorder %s91_s16, %s91_s16 }
  0x10   :  { %p98_p8 = por %p97_p7, %p96_p6 }
  0x12   :  { %p99_p9 = pnand %p98_p8, %p92_p5 }
  0x14   :  { %102 = shalt.err (!%p99_p9)
}
  0x15   :  { %29 = dma.hbm_to_vmem [thread:$0]  %s157_s1, 256, %s27_s12, [#allocation6]  }
  0x16   :  { %123 = dma.done.wait [#allocation3], 256  }
  0x17   :  { %124 = vsyncadd [#allocation3], 4294967040 }
  0x18   :  { %125 = dma.done.wait [#allocation6], 256  }
  0x19   :  { %126 = vsyncadd [#allocation6], 4294967040  ;;  %s131_s19 = smov [#allocation7]   ;;  %v36_v0 = vld [vmem:[#allocation2] sm:$0xff]  ;;  %v38_v1 = vld [vmem:[#allocation5] sm:$0xff] }
  0x1a   :  { %s50_s20 = sshll.u32 %s131_s19, 4  ;;  %v37_v2 = vld [vmem:[#allocation2 + $0x8] sm:$0xff]  ;;  %v40_v3 = vadd.f32 %v38_v1, %v36_v0  ;;  %v39_v4 = vld [vmem:[#allocation5 + $0x8] sm:$0xff]  ;;  %s51_s20 = int_to_ptr.vmem [resolvable:$true] %s50_s20 }
  0x1b   :  { %v41_v5 = vadd.f32 %v39_v4, %v37_v2  ;;  %s103_s0 = scalar_lea.vmem %s51_s20, 256  ;;  %p108_p11 = scmp.lt.s32.totalorder %s51_s20, %s51_s20 }
  0x1c   :  { %42 = vst [vmem:[#allocation7] sm:$0xff] %v40_v3  ;;  %p104_p10 = scmp.ne.s32.totalorder %s51_s20, %s103_s0  ;;  %p109_p12 = scmp.lt.s32.totalorder %s103_s0, %s103_s0 }
  0x1d   :  { %43 = vst [vmem:[#allocation7 + $0x8] sm:$0xff] %v41_v5 }
  0x1e   :  { %p110_p13 = por %p109_p12, %p108_p11 }
  0x20   :  { %p111_p0 = pnand %p110_p13, %p104_p10 }
  0x22   :  { %114 = shalt.err (!%p111_p0)
}
  0x23   :  { %53 = dma.vmem_to_hbm [thread:$0]  %s51_s20, 256, %s158_s2, [#allocation4]  }
  0x24   :  { %127 = dma.done.wait [#allocation4], 256  }
  0x25   :  { %128 = vsyncadd [#allocation4], 4294967040 }
  0x26   :  { %57 = vsyncpa [#allocation3], 1 }
  0x27   :  { %58 = vsyncpa [#allocation6], 1 }
  0x28   :  { %59 = vsyncpa [#allocation4], 1 }

</bundles_post_ra>
